<compile_context>
chip_gen: v5e
topology: v5e:2x2
jax: 0.10.0
libtpu: 0.0.40
codegen_flags: <defaults>
</compile_context>

<pallas_src>
import functools

import jax
import jax.numpy as jnp
from jax.experimental import pallas as pl
from jax.experimental.pallas import tpu as pltpu


# ---------------------------------------------------------------------------
# Kernels: x_ref is a (1, C, T) tile (C on sublanes, T spatial on lanes),
# w_ref / b_ref are (1, C, 1).  Reduction over C = axis 1.
# ---------------------------------------------------------------------------
def _ln_withbias_kernel(x_ref, w_ref, b_ref, o_ref, *, inv_c: float):
    x = x_ref[...].astype(jnp.float32)                      # (1, C, T)
    mu = jnp.sum(x, axis=1, keepdims=True) * inv_c          # (1, 1, T)
    ex2 = jnp.sum(x * x, axis=1, keepdims=True) * inv_c     # (1, 1, T)
    var = ex2 - mu * mu                                     # unbiased=False
    inv = jax.lax.rsqrt(var + 1e-5)                         # (1, 1, T)
    w = w_ref[...].astype(jnp.float32)                      # (1, C, 1)
    b = b_ref[...].astype(jnp.float32)                      # (1, C, 1)
    scale = inv * w                                         # (1, C, T)
    # (x - mu) * inv * w + b  ==  x*scale + (b - mu*scale)
    o_ref[...] = (x * scale + (b - mu * scale)).astype(o_ref.dtype)


def _ln_biasfree_kernel(x_ref, w_ref, o_ref, *, inv_c: float):
    x = x_ref[...].astype(jnp.float32)                      # (1, C, T)
    mu = jnp.sum(x, axis=1, keepdims=True) * inv_c
    ex2 = jnp.sum(x * x, axis=1, keepdims=True) * inv_c
    var = ex2 - mu * mu
    inv = jax.lax.rsqrt(var + 1e-5)
    w = w_ref[...].astype(jnp.float32)                      # (1, C, 1)
    # BiasFree: x / sqrt(var + eps) * w   (x is NOT centered, var IS centered)
    o_ref[...] = (x * (inv * w)).astype(o_ref.dtype)


# ---------------------------------------------------------------------------
# Tiling helper: lane-dense spatial tiles, ~target_bytes per block,
# multiple of 128 (or the full extent), preferring an even divisor of HW.
# ---------------------------------------------------------------------------
def _pick_tile_hw(hw: int, c: int, itemsize: int, target_bytes: int = 2 << 20) -> int:
    if hw <= 256:
        return hw                                  # full-extent block (always legal)
    max_t = max(128, target_bytes // max(1, c * itemsize))
    tile = min(hw, max_t)
    tile -= tile % 128
    tile = max(tile, 128)
    # Prefer a multiple of 128 that divides HW (avoids a ragged, masked last tile).
    t = tile
    while t >= 128:
        if hw % t == 0:
            return t
        t -= 128
    return tile                                    # ragged last block: Pallas masks it


# ---------------------------------------------------------------------------
# Wrapper on the (B, C, HW) layout (reshape of NCHW -- no data movement).
# ---------------------------------------------------------------------------
def layernorm_bchw_flat(x3, weight, bias, *, bias_free: bool, tile_hw=None):
    """x3: (B, C, HW); weight/bias: (C,). Normalizes over C per (b, spatial)."""
    b, c, hw = x3.shape
    itemsize = jnp.dtype(x3.dtype).itemsize
    if tile_hw is None:
        tile_hw = _pick_tile_hw(hw, c, itemsize)
    tile_hw = min(tile_hw, hw)

    grid = (b, pl.cdiv(hw, tile_hw))
    inv_c = 1.0 / float(c)

    x_spec = pl.BlockSpec((1, c, tile_hw), lambda bi, si: (bi, 0, si))
    p_spec = pl.BlockSpec((1, c, 1), lambda bi, si: (0, 0, 0))
    out_spec = pl.BlockSpec((1, c, tile_hw), lambda bi, si: (bi, 0, si))

    cost = pl.CostEstimate(
        flops=8 * b * c * hw,
        transcendentals=b * hw,                     # one rsqrt per pixel
        bytes_accessed=2 * b * c * hw * itemsize + 2 * c * 4,
    )

    w3 = weight.reshape(1, c, 1)

    if bias_free:
        kernel = functools.partial(_ln_biasfree_kernel, inv_c=inv_c)
        in_specs = [x_spec, p_spec]
        args = (x3, w3)
    else:
        kernel = functools.partial(_ln_withbias_kernel, inv_c=inv_c)
        in_specs = [x_spec, p_spec, p_spec]
        args = (x3, w3, bias.reshape(1, c, 1))

    return pl.pallas_call(
        kernel,
        out_shape=jax.ShapeDtypeStruct((b, c, hw), x3.dtype),
        grid_spec=pltpu.PrefetchScalarGridSpec(
            num_scalar_prefetch=0,
            grid=grid,
            in_specs=in_specs,
            out_specs=out_spec,
        ),
        compiler_params=pltpu.CompilerParams(
            dimension_semantics=("parallel", "parallel"),
        ),
        cost_estimate=cost,
    )(*args)


def layer_norm_nchw(x, weight, bias=None, *, layernorm_type: str = "WithBias"):
    """Full module forward: x is NCHW; returns NCHW (same dtype)."""
    b, c, h, w = x.shape
    bias_free = layernorm_type == "BiasFree"
    x3 = x.reshape(b, c, h * w)                     # free reshape, no transpose
    y3 = layernorm_bchw_flat(x3, weight, bias, bias_free=bias_free)
    return y3.reshape(b, c, h, w)


# ---------------------------------------------------------------------------
# Pure-JAX reference (mirrors the PyTorch module exactly, via to_3d layout).
# ---------------------------------------------------------------------------
def _reference_nchw(x, weight, bias, *, layernorm_type: str = "WithBias"):
    b, c, h, w = x.shape
    x3 = jnp.transpose(x, (0, 2, 3, 1)).reshape(b, h * w, c).astype(jnp.float32)
    mu = jnp.mean(x3, axis=-1, keepdims=True)
    var = jnp.mean((x3 - mu) ** 2, axis=-1, keepdims=True)
    if layernorm_type == "BiasFree":
        y = x3 / jnp.sqrt(var + 1e-5) * weight
    else:
        y = (x3 - mu) / jnp.sqrt(var + 1e-5) * weight + bias
    return jnp.transpose(y.reshape(b, h, w, c), (0, 3, 1, 2)).astype(x.dtype)


if __name__ == "__main__":
    key = jax.random.PRNGKey(0)
    k_x, k_w, k_b = jax.random.split(key, 3)

    B, C, H, W = 2, 4, 16, 16
    x = jax.random.normal(k_x, (B, C, H, W), dtype=jnp.float32)
    # Module init is ones/zeros; use deterministic non-trivial params to
    # actually exercise the scale/shift math.
    weight = 1.0 + 0.1 * jax.random.normal(k_w, (C,), dtype=jnp.float32)
    bias = 0.1 * jax.random.normal(k_b, (C,), dtype=jnp.float32)

    out_wb = jax.block_until_ready(
        layer_norm_nchw(x, weight, bias, layernorm_type="WithBias"))
    out_bf = jax.block_until_ready(
        layer_norm_nchw(x, weight, None, layernorm_type="BiasFree"))

    ref_wb = _reference_nchw(x, weight, bias, layernorm_type="WithBias")
    ref_bf = _reference_nchw(x, weight, bias, layernorm_type="BiasFree")

    assert out_wb.shape == (B, C, H, W)
    assert out_bf.shape == (B, C, H, W)
    assert jnp.allclose(out_wb, ref_wb, atol=1e-5, rtol=1e-5)
    assert jnp.allclose(out_bf, ref_bf, atol=1e-5, rtol=1e-5)

    print("KERNEL_OK")
</pallas_src>

<mosaic_0001>
module attributes {stable_mosaic.version = 11 : i64} {
  func.func @_ln_withbias_kernel(%arg0: i32, %arg1: i32, %arg2: memref<1x4x256xf32, #tpu.memory_space<vmem>>, %arg3: memref<1x4x1xf32, #tpu.memory_space<vmem>>, %arg4: memref<1x4x1xf32, #tpu.memory_space<vmem>>, %arg5: memref<1x4x256xf32, #tpu.memory_space<vmem>>) attributes {dimension_semantics = [#tpu.dimension_semantics<parallel>, #tpu.dimension_semantics<parallel>], iteration_bounds = array<i64: 2, 1>, scalar_prefetch = 0 : i64, scratch_operands = 0 : i64, tpu.core_type = #tpu.core_type<tc>, window_params = [{transform_indices = @transform_0, window_bounds = array<i64: 1, 4, 256>}, {pipeline_mode = #tpu.pipeline_mode<synchronous>, transform_indices = @transform_1, window_bounds = array<i64: 1, 4, 1>}, {pipeline_mode = #tpu.pipeline_mode<synchronous>, transform_indices = @transform_2, window_bounds = array<i64: 1, 4, 1>}, {transform_indices = @transform_3, window_bounds = array<i64: 1, 4, 256>}]} {
    %c0 = arith.constant 0 : index
    %c0_0 = arith.constant 0 : index
    %c0_1 = arith.constant 0 : index
    %0 = vector.load %arg2[%c0, %c0_0, %c0_1] : memref<1x4x256xf32, #tpu.memory_space<vmem>>, vector<1x4x256xf32>
    %cst = arith.constant dense<0.000000e+00> : vector<1x256xf32>
    %1 = vector.multi_reduction <add>, %0, %cst [1] : vector<1x4x256xf32> to vector<1x256xf32>
    %2 = vector.shape_cast %1 : vector<1x256xf32> to vector<1x1x256xf32>
    %cst_2 = arith.constant 2.500000e-01 : f32
    %3 = vector.broadcast %cst_2 : f32 to vector<1x1x256xf32>
    %4 = arith.mulf %2, %3 : vector<1x1x256xf32>
    %5 = arith.mulf %0, %0 : vector<1x4x256xf32>
    %cst_3 = arith.constant dense<0.000000e+00> : vector<1x256xf32>
    %6 = vector.multi_reduction <add>, %5, %cst_3 [1] : vector<1x4x256xf32> to vector<1x256xf32>
    %7 = vector.shape_cast %6 : vector<1x256xf32> to vector<1x1x256xf32>
    %cst_4 = arith.constant 2.500000e-01 : f32
    %8 = vector.broadcast %cst_4 : f32 to vector<1x1x256xf32>
    %9 = arith.mulf %7, %8 : vector<1x1x256xf32>
    %10 = arith.mulf %4, %4 : vector<1x1x256xf32>
    %11 = arith.subf %9, %10 : vector<1x1x256xf32>
    %cst_5 = arith.constant 9.99999974E-6 : f32
    %12 = vector.broadcast %cst_5 : f32 to vector<1x1x256xf32>
    %13 = arith.addf %11, %12 : vector<1x1x256xf32>
    %14 = math.rsqrt %13 : vector<1x1x256xf32>
    %c0_6 = arith.constant 0 : index
    %c0_7 = arith.constant 0 : index
    %c0_8 = arith.constant 0 : index
    %15 = vector.load %arg3[%c0_6, %c0_7, %c0_8] : memref<1x4x1xf32, #tpu.memory_space<vmem>>, vector<1x4x1xf32>
    %c0_9 = arith.constant 0 : index
    %c0_10 = arith.constant 0 : index
    %c0_11 = arith.constant 0 : index
    %16 = vector.load %arg4[%c0_9, %c0_10, %c0_11] : memref<1x4x1xf32, #tpu.memory_space<vmem>>, vector<1x4x1xf32>
    %17 = vector.broadcast %14 : vector<1x1x256xf32> to vector<1x4x256xf32>
    %18 = vector.broadcast %15 : vector<1x4x1xf32> to vector<1x4x256xf32>
    %19 = arith.mulf %17, %18 : vector<1x4x256xf32>
    %20 = arith.mulf %0, %19 : vector<1x4x256xf32>
    %21 = vector.broadcast %4 : vector<1x1x256xf32> to vector<1x4x256xf32>
    %22 = arith.mulf %21, %19 : vector<1x4x256xf32>
    %23 = vector.broadcast %16 : vector<1x4x1xf32> to vector<1x4x256xf32>
    %24 = arith.subf %23, %22 : vector<1x4x256xf32>
    %25 = arith.addf %20, %24 : vector<1x4x256xf32>
    %c0_12 = arith.constant 0 : index
    %c0_13 = arith.constant 0 : index
    %c0_14 = arith.constant 0 : index
    %26 = vector.load %arg5[%c0_12, %c0_13, %c0_14] : memref<1x4x256xf32, #tpu.memory_space<vmem>>, vector<1x4x256xf32>
    tpu.vector_store %arg5[%c0_12, %c0_13, %c0_14], %25 {strides = array<i32>} : memref<1x4x256xf32, #tpu.memory_space<vmem>>, vector<1x4x256xf32>,
    return
  }
  func.func @transform_0(%arg0: i32, %arg1: i32) -> (i32, i32, i32) {
    %c0_i32 = arith.constant 0 : i32
    %c0_i32_0 = arith.constant 0 : i32
    return %arg0, %c0_i32, %arg1 : i32, i32, i32
  }
  func.func @transform_1(%arg0: i32, %arg1: i32) -> (i32, i32, i32) {
    %c0_i32 = arith.constant 0 : i32
    %c0_i32_0 = arith.constant 0 : i32
    %c0_i32_1 = arith.constant 0 : i32
    %c0_i32_2 = arith.constant 0 : i32
    return %c0_i32, %c0_i32_0, %c0_i32_1 : i32, i32, i32
  }
  func.func @transform_2(%arg0: i32, %arg1: i32) -> (i32, i32, i32) {
    %c0_i32 = arith.constant 0 : i32
    %c0_i32_0 = arith.constant 0 : i32
    %c0_i32_1 = arith.constant 0 : i32
    %c0_i32_2 = arith.constant 0 : i32
    return %c0_i32, %c0_i32_0, %c0_i32_1 : i32, i32, i32
  }
  func.func @transform_3(%arg0: i32, %arg1: i32) -> (i32, i32, i32) {
    %c0_i32 = arith.constant 0 : i32
    %c0_i32_0 = arith.constant 0 : i32
    return %arg0, %c0_i32, %arg1 : i32, i32, i32
  }
}

</mosaic_0001>

<bundles_post_ra>
// kernel: tpu_custom_call.1
= control target key start
LH: loop header
LB: loop body
LE: loop exit
PB: predicated region body
PF: predicated region fallthrough
CT: control target
= control target key end

     0   :  { %8 = vsyncpa [#allocation3], 0  ;;  %s778_s0 = inlined_call_operand.hbm [shape: f32[2,4,256], index: 0, kind: input, shape index: {}]   ;;  %s779_s1 = inlined_call_operand.vmem [shape: f32[1,4,1], index: 1, kind: input, shape index: {}]   ;;  %s780_s2 = inlined_call_operand.vmem [shape: f32[1,4,1], index: 2, kind: input, shape index: {}]   ;;  %s781_s3 = inlined_call_operand.hbm [shape: f32[2,4,256], index: 3, kind: output, shape index: {}]  }
   0x1   :  { %10 = vsyncpa [#allocation3 + $0x1], 0 }
   0x2   :  { %11 = vsyncpa [#allocation4], 0 }
   0x3   :  { %13 = vsyncpa [#allocation4 + $0x1], 0  ;;  %s636_s12 = smov 0   ;;  %s638_s13 = smov 0  }
   0x4   :  { %s640_s14 = smov 0   ;;  %s642_s15 = smov 0  }
   0x5   :  { %s644_s16 = smov 0   ;;  %s646_s17 = smov 0  }
   0x6 LB: > { %s416_s18 = sadd.s32 4294967295, %s613_s17   ;;  %s417_s19 = sadd.s32 4294967294, %s613_s17   ;;  %s613_s17 = sphi %s646_s17, %s19_s17   ;;  %s609_s16 = sphi %s644_s16, %s790_s16   ;;  %s605_s15 = sphi %s642_s15, %s789_s15   ;;  %s601_s14 = sphi %s640_s14, %s788_s14   ;;  %s597_s13 = sphi %s638_s13, %s787_s13   ;;  %s593_s12 = sphi %s636_s12, %s786_s12  }
   0x7   : > { %s31_s20 = sadd.s32 1, %s609_s16  ;;  %s40_s21 = sadd.s32 1, %s601_s14 }
   0x8   : > { %p33_p0 = scmp.ge.s32.totalorder %s31_s20, 2  ;;  %p47_p1 = scmp.ne.s32.totalorder %s601_s14, %s597_s13 }
   0x9   : > { %p48_p2 = scmp.eq.s32.totalorder %s613_s17, 0  ;;  %p53_p3 = scmp.ne.s32.totalorder %s597_s13, %s593_s12 }
   0xa   : > { %s792_s20 = smov (%p33_p0, %s31_s20), 0  ;;  %p54_p5 = scmp.eq.s32.totalorder %s416_s18, 0 }
   0xb   : > { %p677_p4 = por %p48_p2, %p47_p1  ;;  %s35_s23 = ssub.s32 %s609_s16, %s792_s20 }
   0xc   : > { %p121_p6 = scmp.eq.s32.totalorder %s416_s18, 1  ;;  %p38_p7 = scmp.eq.s32.totalorder %s35_s23, 0 }
   0xd   : > { %p683_p8 = por %p54_p5, %p53_p3  ;;  %p127_p10 = scmp.eq.s32.totalorder %s417_s19, 1 }
   0xe   : > { %p687_p9 = por %p121_p6, %p47_p1  ;;  %p419_p12 = scmp.ge.s32.totalorder %s613_s17, 2 }
   0xf   : > { %s692_s26 = scalar_select %p38_p7, %s601_s14, %s40_s21  }
  0x10   : > { %p694_p11 = por %p127_p10, %p53_p3  ;;  %p445_p13 = scmp.lt.s32.totalorder %s613_s17, 2 }
  0x11   : > { %s153_s28 = sand.u32 1, %s601_s14   ;;  %s431_s30 = sshll.u32 %s609_s16, 3 }
  0x12   : > { %s420_s29 = sshll.u32 %s153_s28, 3  ;;  %s164_s6 = scalar_lea.hbm %s778_s0, %s431_s30 }
  0x13   : > { %s157_s7 = scalar_lea.vmem [#allocation2], %s420_s29  ;;  %s166_s9 = sshll.u32 %s164_s6, 4  ;;  %s167_s9 = int_to_ptr.hbm [resolvable:$true] %s166_s9 }
  0x14   : > { %s168_s8 = sshll.u32 %s157_s7, 4  ;;  %p438_p0 = pnand %p445_p13, %p677_p4  ;;  %s169_s8 = int_to_ptr.vmem [resolvable:$true] %s168_s8 }
  0x15   : > { %p423_p1 = scmp.ge.s32.totalorder %s613_s17, 1  ;;  %p173_p2 = scmp.lt.s32.totalorder %s613_s17, 3 }
  0x16   : > { %s154_s10 = scalar_lea.sflag [#allocation3], %s153_s28 }
  0x17   : > { %440 = dma.hbm_to_vmem [thread:$0]  (!%p438_p0), %s167_s9, 128, %s169_s8, %s154_s10  }
  0x18   : > { %p174_p3 = pnand %p423_p1, %p173_p2 }
  0x19   : > { %s710_s11 = sand.u32 (!%p174_p3), 1, %s597_s13  }
  0x1a   : > { %177 = sbr.rel (%p174_p3) target bundleno = 167 (0xa7), region = 32  ;;  %s424_s18 = sshll.u32 (!%p174_p3), %s710_s11, 3 }
  0x1b   : > { %s180_s19 = scalar_lea.sflag (!%p174_p3), [#allocation3], %s710_s11  ;;  %s183_s21 = scalar_lea.vmem (!%p174_p3), [#allocation2], %s424_s18 }
  0x1f   : > { %584 = dma.done.wait (%p683_p8), %s180_s19, 128  }
  0x20   : > { %586 = vsyncadd (%p683_p8), %s180_s19, 4294967168  ;;  %v615_v0 = vmov 0   ;;  %v282_v1 = vld [vmem:[%s779_s1] sm:$0xf]  ;;  %v726_v3 = vld [vmem:[%s183_s21] sm:$0xff]  ;;  %vm216_vm0 = vcmask 1043456  }
  0x21   : > { %496 = vset.pattern.permute.xlu0 %v615_v0  ;;  %v283_v2 = vld [vmem:[%s780_s2] sm:$0xf]  ;;  %211 = vst [vmem:[#allocation1] ss:$2 sm:$0xff] %v726_v3  ;;  %v233_v4 = vmul.f32 %v726_v3, %v726_v3  ;;  %s432_s24 = sshll.u32 %s605_s15, 3  ;;  %s206_s6 = scalar_lea.vmem [#allocation5], %s424_s18 }
  0x22   : > { %286 = vperm.xlu0 %496, %v282_v1   ;;  %s327_s5 = scalar_lea.hbm %s781_s3, %s432_s24  ;;  %s329_s7 = sshll.u32 %s206_s6, 4  ;;  %s330_s7 = int_to_ptr.vmem [resolvable:$true] %s329_s7 }
  0x23   : > { %s331_s8 = sshll.u32 %s327_s5, 4  ;;  %s314_s15 = scalar_lea.sflag [#allocation4], %s710_s11  ;;  %s332_s8 = int_to_ptr.hbm [resolvable:$true] %s331_s8 }
  0x24   : > { %s545_s9 = sshra.s32 %s332_s8, 4  ;;  %s551_s21 = scalar_lea.hbm %s781_s3, 16  ;;  %s546_s9 = int_to_ptr.hbm [resolvable:$true] %s545_s9 }
  0x25   : > { %s547_s10 = scalar_lea.hbm %s546_s9, 8  ;;  %p552_p7 = scmp.lt.s32.totalorder %s546_s9, %s781_s3 }
  0x26   : > { %p548_p4 = scmp.ne.s32.totalorder %s546_s9, %s547_s10  ;;  %p553_p8 = scmp.lt.s32.totalorder %s551_s21, %s547_s10 }
  0x28   : > { %v212_v5 = vld.sshfl [vmem:[#allocation1] sm:$0xff pattern:$0x75316420]  ;;  %v213_v6 = vld.sshfl [vmem:[#allocation1 + $0x8] sm:$0xff pattern:$0x75316420]  ;;  %p549_p5 = pnand %p548_p4, %p687_p9  ;;  %p554_p10 = por %p553_p8, %p552_p7 }
  0x29   : > { %235 = vst [vmem:[#allocation1] ss:$2 sm:$0xff] %v233_v4  ;;  %v217_v7 = vsel %vm216_vm0, %v212_v5, 0.0  ;;  %v224_v8 = vsel %vm216_vm0, %v213_v6, 0.0 }
  0x2a   : > { %301 = vperm.xlu0 %496, %v283_v2   ;;  %v225_v9 = vrot.slane %v224_v8, 4  ;;  %v218_v12 = vrot.slane %v217_v7, 4  ;;  %p550_p6 = pneg %p549_p5 }
  0x2c   : > { %v226_v13 = vadd.f32 %v225_v9, %v224_v8  ;;  %v219_v17 = vadd.f32 %v218_v12, %v217_v7  ;;  %p555_p13 = pnand %p554_p10, %p550_p6 }
  0x2e   : > { %v227_v18 = vrot.slane %v226_v13, 2  ;;  %v220_v21 = vrot.slane %v219_v17, 2 }
  0x30   : > { %v236_v10 = vld.sshfl [vmem:[#allocation1] sm:$0xff pattern:$0x75316420]  ;;  %v237_v11 = vld.sshfl [vmem:[#allocation1 + $0x8] sm:$0xff pattern:$0x75316420]  ;;  %v228_v22 = vadd.f32 %v227_v18, %v226_v13  ;;  %v221_v25 = vadd.f32 %v220_v21, %v219_v17 }
  0x31   : > { %v247_v14 = vsel %vm216_vm0, %v237_v11, 0.0  ;;  %v240_v15 = vsel %vm216_vm0, %v236_v10, 0.0 }
  0x32   : > { %v248_v16 = vrot.slane %v247_v14, 4  ;;  %v241_v19 = vrot.slane %v240_v15, 4  ;;  %v229_v26 = vrot.slane %v228_v22, 1  ;;  %v222_v29 = vrot.slane %v221_v25, 1 }
  0x34   : > { %v249_v20 = vadd.f32 %v248_v16, %v247_v14  ;;  %v242_v23 = vadd.f32 %v241_v19, %v240_v15  ;;  %v230_v30 = vadd.f32 %v229_v26, %v228_v22  ;;  %v223_v33 = vadd.f32 %v222_v29, %v221_v25 }
  0x36   : > { %v250_v24 = vrot.slane %v249_v20, 2  ;;  %v243_v27 = vrot.slane %v242_v23, 2  ;;  %v232_v34 = vmul.f32 0.25, %v230_v30  ;;  %v231_v37 = vmul.f32 0.25, %v223_v33 }
  0x38   : > { %v251_v28 = vadd.f32 %v250_v24, %v249_v20  ;;  %v244_v31 = vadd.f32 %v243_v27, %v242_v23  ;;  %v257_v40 = vmul.f32 %v232_v34, %v232_v34  ;;  %v256_v42 = vmul.f32 %v231_v37, %v231_v37 }
  0x3a   : > { %v252_v32 = vrot.slane %v251_v28, 1  ;;  %v245_v35 = vrot.slane %v244_v31, 1 }
  0x3c   : > { %v253_v36 = vadd.f32 %v252_v32, %v251_v28  ;;  %v246_v38 = vadd.f32 %v245_v35, %v244_v31 }
  0x3e   : > { %v255_v39 = vmul.f32 0.25, %v253_v36  ;;  %v254_v41 = vmul.f32 0.25, %v246_v38 }
  0x40   : > { %v259_v43 = vsub.f32 %v255_v39, %v257_v40  ;;  %v258_v44 = vsub.f32 %v254_v41, %v256_v42 }
  0x42   : > { %v261_v45 = vadd.f32 1e-05, %v259_v43  ;;  %v260_v46 = vadd.f32 1e-05, %v258_v44 }
  0x44   : > { %497 = vrsqrt.f32 %v261_v45  ;;  %vm278_vm1 = vweird.f32 %v261_v45  ;;  %vm268_vm4 = vweird.f32 %v260_v46 }
  0x45   : > { %499 = vrsqrt.f32 %v260_v46 }
  0x4a   : > { %v498_v47 = vpop.eup %497 }
  0x4b   : > { %v273_v48 = vmul.f32 %v498_v47, %v261_v45  ;;  %v500_v49 = vpop.eup %499  ;;  %vm279_vm2 = vweird.f32 %v498_v47 }
  0x4c   : > { %v263_v50 = vmul.f32 %v500_v49, %v260_v46  ;;  %vm280_vm3 = vmor %vm278_vm1, %vm279_vm2  ;;  %vm269_vm5 = vweird.f32 %v500_v49 }
  0x4d   : > { %v274_v51 = vmul.f32 %v498_v47, %v273_v48  ;;  %vm270_vm6 = vmor %vm268_vm4, %vm269_vm5 }
  0x4e   : > { %v264_v52 = vmul.f32 %v500_v49, %v263_v50 }
  0x4f   : > { %v275_v53 = vmul.f32 0.5, %v274_v51 }
  0x50   : > { %v265_v54 = vmul.f32 0.5, %v264_v52 }
  0x51   : > { %v276_v55 = vsub.f32 1.5, %v275_v53 }
  0x52   : > { %v266_v56 = vsub.f32 1.5, %v265_v54 }
  0x53   : > { %v277_v57 = vmul.f32 %v498_v47, %v276_v55 }
  0x54   : > { %v267_v58 = vmul.f32 %v500_v49, %v266_v56 }
  0x55   : > { %v281_v59 = vsel %vm280_vm3, %v498_v47, %v277_v57 }
  0x56   : > { %v271_v62 = vsel %vm270_vm6, %v500_v49, %v267_v58 }
  0x94   : > { %v287_v60 = vpop.permute.xlu0 %286 }
  0x95   : > { %v290_v61 = vmul.f32 %v287_v60, %v281_v59  ;;  %v289_v63 = vmul.f32 %v287_v60, %v271_v62 }
  0x97   : > { %v293_v0 = vrot.slane %v290_v61, 4  ;;  %v298_v1 = vmul.f32 %v290_v61, %v232_v34  ;;  %v297_v5 = vmul.f32 %v289_v63, %v231_v37 }
  0x99   : > { %v294_v4 = vsel %vm216_vm0, %v289_v63, %v293_v0 }
  0x9a   : > { %v296_v9 = vmul.f32 %v294_v4, %v726_v3 }
  0x9c   : > { %v302_v2 = vpop.permute.xlu0 %301 }
  0x9d   : > { %v305_v6 = vsub.f32 %v302_v2, %v298_v1  ;;  %v304_v7 = vsub.f32 %v302_v2, %v297_v5 }
  0x9f   : > { %v308_v8 = vrot.slane %v305_v6, 4 }
  0xa1   : > { %v309_v10 = vsel %vm216_vm0, %v304_v7, %v308_v8 }
  0xa2   : > { %v311_v11 = vadd.f32 %v309_v10, %v296_v9 }
  0xa4   : > { %312 = vst [vmem:[%s206_s6] sm:$0xff] %v311_v11 }
  0xa5   : > { %558 = shalt.err (!%p555_p13)
}
  0xa6   : > { %435 = dma.vmem_to_hbm [thread:$0]  (%p687_p9), %s330_s7, 128, %s332_s8, %s314_s15  }
  0xa7 PF: > { %s343_s11 = sand.u32 1, %s593_s12   ;;  %p442_p0 = pnand %p419_p12, %p694_p11 }
  0xa8   : > { %s344_s28 = scalar_lea.sflag [#allocation4], %s343_s11 }
  0xa9   : > { %p443_p1 = pneg %p442_p0 }
  0xab   : > { %588 = dma.done.wait (%p443_p1), %s344_s28, 128  }
  0xac   : > { %590 = vsyncadd (%p443_p1), %s344_s28, 4294967168  ;;  %s19_s17 = sadd.s32 1, %s613_s17   ;;  %s786_s12 = smov %s597_s13 }
  0xad   : > { %p16_p2 = scmp.ge.s32.totalorder %s19_s17, 4   ;;  %s787_s13 = smov %s601_s14 }
  0xae   : > { %s788_s14 = smov %s692_s26  ;;  %s789_s15 = smov %s609_s16 }
  0xaf   : > { %s790_s16 = smov %s792_s20  ;;  %18 = sbr.rel (!%p16_p2) target bundleno = 6 (0x6), region = 77 }
  0xb4   :  { %350 = vsyncpa [#allocation3], 1 }
  0xb5   :  { %352 = vsyncpa [#allocation3 + $0x1], 1 }
  0xb6   :  { %353 = vsyncpa [#allocation4], 1 }
  0xb7   :  { %355 = vsyncpa [#allocation4 + $0x1], 1 }

</bundles_post_ra>
